<compile_context>
chip_gen: v5e
topology: v5e:2x2
jax: 0.10.0
libtpu: 0.0.40
codegen_flags: <defaults>
</compile_context>

<pallas_src>
import math

import jax
import jax.numpy as jnp
from jax.experimental import pallas as pl
from jax.experimental.pallas import tpu as pltpu  # noqa: F401  (kept for TPU params if needed)


def hypercell_kernel(x_ref, s0_ref, wi_h_ref, wi_t_ref, bi_h_ref, bi_t_ref,
                     z_ref, wc_h_ref, wc_t_ref, bc_h_ref, bc_t_ref, sout_ref):
    depth = z_ref.shape[0]

    s = s0_ref[...].astype(jnp.float32)          # (B, H) carried in registers
    x = x_ref[...]                               # (B, E)

    # Static unroll over depth — gives the LLO scheduler full visibility and
    # lets layer l's weight loads overlap layer l-1's tanh/sigmoid latency.
    for l in range(depth):
        z = z_ref[l]                             # (B, H)

        # cell[l](s, z[l]) with weights pre-split into h/t halves and
        # pre-transposed to (H, H): no .T, no concat, no lane-offset slice.
        h_pre = (jnp.dot(s, wc_h_ref[l], preferred_element_type=jnp.float32)
                 * z + bc_h_ref[l])              # (B, H)
        t_pre = (jnp.dot(s, wc_t_ref[l], preferred_element_type=jnp.float32)
                 * z + bc_t_ref[l])              # (B, H)

        if l == 0:
            # inp(x, z[0]) — computed exactly once (Python-level branch).
            h_pre = h_pre + (jnp.dot(x, wi_h_ref[...],
                                     preferred_element_type=jnp.float32)
                             * z + bi_h_ref[...])
            t_pre = t_pre + (jnp.dot(x, wi_t_ref[...],
                                     preferred_element_type=jnp.float32)
                             * z + bi_t_ref[...])

        # highwayGate (eval mode: F.dropout with training=False is identity).
        # TODO(synk): training-mode dropout on the transform gate is not implemented.
        hh = jnp.tanh(h_pre)
        tt = jax.nn.sigmoid(t_pre)
        s = hh * tt + s * (1.0 - tt)             # (B, H)

        sout_ref[l] = s.astype(sout_ref.dtype)


def hypercell_forward(x, s, z, w_inp, b_inp, w_cell, b_cell):
    """Runs the full depth loop inside one pallas_call (no grid)."""
    depth, B, H = z.shape

    # One-time layout prep in plain XLA: split h/t halves, transpose to
    # (in_features, out_features) so the kernel never transposes on the XLU.
    wi_h = w_inp[:H, :].T                        # (E, H)
    wi_t = w_inp[H:, :].T                        # (E, H)
    bi_h = b_inp[:H].reshape(1, H)
    bi_t = b_inp[H:].reshape(1, H)
    wc_h = jnp.swapaxes(w_cell[:, :H, :], 1, 2)  # (depth, H, H)
    wc_t = jnp.swapaxes(w_cell[:, H:, :], 1, 2)  # (depth, H, H)
    bc_h = b_cell[:, :H].reshape(depth, 1, H)
    bc_t = b_cell[:, H:].reshape(depth, 1, H)

    s_out = pl.pallas_call(
        hypercell_kernel,
        out_shape=jax.ShapeDtypeStruct((depth, B, H), jnp.float32),
    )(x, s, wi_h, wi_t, bi_h, bi_t, z, wc_h, wc_t, bc_h, bc_t)
    return s_out[-1], s_out


def hypercell_ref(x, s, z, w_inp, b_inp, w_cell, b_cell):
    """Pure-JAX reference (mirrors the PyTorch forward, eval mode)."""
    depth, _, H = z.shape
    s_list = []
    for l in range(depth):
        zz = jnp.concatenate([z[l], z[l]], axis=1)
        Ws = (s @ w_cell[l].T) * zz + b_cell[l]
        if l == 0:
            Ws = Ws + (x @ w_inp.T) * zz + b_inp
        hh = jnp.tanh(Ws[:, :H])
        tt = jax.nn.sigmoid(Ws[:, H:])
        s = hh * tt + s * (1.0 - tt)
        s_list.append(s)
    return s, jnp.stack(s_list)


if __name__ == "__main__":
    B, embedDim, H, depth = 4, 32, 32, 3
    gateDrop = 0.1  # irrelevant in eval mode (trainable=False)

    key = jax.random.PRNGKey(0)
    k = iter(jax.random.split(key, 10))

    # Inputs.
    x = jax.random.normal(next(k), (B, embedDim), dtype=jnp.float32)
    s0 = jax.random.normal(next(k), (B, H), dtype=jnp.float32)
    z = jax.random.normal(next(k), (depth, B, H), dtype=jnp.float32)

    # Deterministic parameter init, matching nn.Linear-style uniform(-stdv, stdv).
    stdv_inp = 1.0 / math.sqrt(embedDim)
    w_inp = jax.random.uniform(next(k), (2 * H, embedDim),
                               minval=-stdv_inp, maxval=stdv_inp,
                               dtype=jnp.float32)
    b_inp = jax.random.uniform(next(k), (2 * H,),
                               minval=-stdv_inp, maxval=stdv_inp,
                               dtype=jnp.float32)
    stdv_cell = 1.0 / math.sqrt(H)
    w_cell = jax.random.uniform(next(k), (depth, 2 * H, H),
                                minval=-stdv_cell, maxval=stdv_cell,
                                dtype=jnp.float32)
    b_cell = jax.random.uniform(next(k), (depth, 2 * H),
                                minval=-stdv_cell, maxval=stdv_cell,
                                dtype=jnp.float32)

    s_final, s_all = hypercell_forward(x, s0, z, w_inp, b_inp, w_cell, b_cell)
    jax.block_until_ready((s_final, s_all))

    s_final_ref, s_all_ref = hypercell_ref(x, s0, z, w_inp, b_inp, w_cell, b_cell)
    assert jnp.allclose(s_all, s_all_ref, atol=1e-5, rtol=1e-5)
    assert jnp.allclose(s_final, s_final_ref, atol=1e-5, rtol=1e-5)

    print("KERNEL_OK")
</pallas_src>

<mosaic_0001>
module attributes {stable_mosaic.version = 11 : i64} {
  func.func @hypercell_kernel(%arg0: memref<4x32xf32, #tpu.memory_space<vmem>>, %arg1: memref<4x32xf32, #tpu.memory_space<vmem>>, %arg2: memref<32x32xf32, #tpu.memory_space<vmem>>, %arg3: memref<32x32xf32, #tpu.memory_space<vmem>>, %arg4: memref<1x32xf32, #tpu.memory_space<vmem>>, %arg5: memref<1x32xf32, #tpu.memory_space<vmem>>, %arg6: memref<3x4x32xf32, #tpu.memory_space<vmem>>, %arg7: memref<3x32x32xf32, #tpu.memory_space<vmem>>, %arg8: memref<3x32x32xf32, #tpu.memory_space<vmem>>, %arg9: memref<3x1x32xf32, #tpu.memory_space<vmem>>, %arg10: memref<3x1x32xf32, #tpu.memory_space<vmem>>, %arg11: memref<3x4x32xf32, #tpu.memory_space<vmem>>) attributes {dimension_semantics = [], scalar_prefetch = 0 : i64, scratch_operands = 0 : i64, tpu.core_type = #tpu.core_type<tc>} {
    %c0 = arith.constant 0 : index
    %c0_0 = arith.constant 0 : index
    %0 = vector.load %arg1[%c0, %c0_0] : memref<4x32xf32, #tpu.memory_space<vmem>>, vector<4x32xf32>
    %c0_1 = arith.constant 0 : index
    %c0_2 = arith.constant 0 : index
    %1 = vector.load %arg0[%c0_1, %c0_2] : memref<4x32xf32, #tpu.memory_space<vmem>>, vector<4x32xf32>
    %c0_3 = arith.constant 0 : index
    %c0_4 = arith.constant 0 : index
    %c0_5 = arith.constant 0 : index
    %2 = vector.load %arg6[%c0_3, %c0_4, %c0_5] : memref<3x4x32xf32, #tpu.memory_space<vmem>>, vector<1x4x32xf32>
    %3 = vector.shape_cast %2 : vector<1x4x32xf32> to vector<4x32xf32>
    %c0_6 = arith.constant 0 : index
    %c0_7 = arith.constant 0 : index
    %c0_8 = arith.constant 0 : index
    %4 = vector.load %arg7[%c0_6, %c0_7, %c0_8] : memref<3x32x32xf32, #tpu.memory_space<vmem>>, vector<1x32x32xf32>
    %5 = vector.shape_cast %4 : vector<1x32x32xf32> to vector<32x32xf32>
    %cst = arith.constant dense<0.000000e+00> : vector<4x32xf32>
    %6 = tpu.matmul %0, %5, %cst {dimension_numbers = #tpu.dot_dimension_numbers<[1], [0], [0], [1], [0, 0, 1, 1], [], []>} : vector<4x32xf32>, vector<32x32xf32>, vector<4x32xf32> -> vector<4x32xf32>
    %7 = arith.mulf %6, %3 : vector<4x32xf32>
    %c0_9 = arith.constant 0 : index
    %c0_10 = arith.constant 0 : index
    %c0_11 = arith.constant 0 : index
    %8 = vector.load %arg9[%c0_9, %c0_10, %c0_11] : memref<3x1x32xf32, #tpu.memory_space<vmem>>, vector<1x1x32xf32>
    %9 = vector.shape_cast %8 : vector<1x1x32xf32> to vector<1x32xf32>
    %10 = vector.broadcast %9 : vector<1x32xf32> to vector<4x32xf32>
    %11 = arith.addf %7, %10 : vector<4x32xf32>
    %c0_12 = arith.constant 0 : index
    %c0_13 = arith.constant 0 : index
    %c0_14 = arith.constant 0 : index
    %12 = vector.load %arg8[%c0_12, %c0_13, %c0_14] : memref<3x32x32xf32, #tpu.memory_space<vmem>>, vector<1x32x32xf32>
    %13 = vector.shape_cast %12 : vector<1x32x32xf32> to vector<32x32xf32>
    %cst_15 = arith.constant dense<0.000000e+00> : vector<4x32xf32>
    %14 = tpu.matmul %0, %13, %cst_15 {dimension_numbers = #tpu.dot_dimension_numbers<[1], [0], [0], [1], [0, 0, 1, 1], [], []>} : vector<4x32xf32>, vector<32x32xf32>, vector<4x32xf32> -> vector<4x32xf32>
    %15 = arith.mulf %14, %3 : vector<4x32xf32>
    %c0_16 = arith.constant 0 : index
    %c0_17 = arith.constant 0 : index
    %c0_18 = arith.constant 0 : index
    %16 = vector.load %arg10[%c0_16, %c0_17, %c0_18] : memref<3x1x32xf32, #tpu.memory_space<vmem>>, vector<1x1x32xf32>
    %17 = vector.shape_cast %16 : vector<1x1x32xf32> to vector<1x32xf32>
    %18 = vector.broadcast %17 : vector<1x32xf32> to vector<4x32xf32>
    %19 = arith.addf %15, %18 : vector<4x32xf32>
    %c0_19 = arith.constant 0 : index
    %c0_20 = arith.constant 0 : index
    %20 = vector.load %arg2[%c0_19, %c0_20] : memref<32x32xf32, #tpu.memory_space<vmem>>, vector<32x32xf32>
    %cst_21 = arith.constant dense<0.000000e+00> : vector<4x32xf32>
    %21 = tpu.matmul %1, %20, %cst_21 {dimension_numbers = #tpu.dot_dimension_numbers<[1], [0], [0], [1], [0, 0, 1, 1], [], []>} : vector<4x32xf32>, vector<32x32xf32>, vector<4x32xf32> -> vector<4x32xf32>
    %22 = arith.mulf %21, %3 : vector<4x32xf32>
    %c0_22 = arith.constant 0 : index
    %c0_23 = arith.constant 0 : index
    %23 = vector.load %arg4[%c0_22, %c0_23] : memref<1x32xf32, #tpu.memory_space<vmem>>, vector<1x32xf32>
    %24 = vector.broadcast %23 : vector<1x32xf32> to vector<4x32xf32>
    %25 = arith.addf %22, %24 : vector<4x32xf32>
    %26 = arith.addf %11, %25 : vector<4x32xf32>
    %c0_24 = arith.constant 0 : index
    %c0_25 = arith.constant 0 : index
    %27 = vector.load %arg3[%c0_24, %c0_25] : memref<32x32xf32, #tpu.memory_space<vmem>>, vector<32x32xf32>
    %cst_26 = arith.constant dense<0.000000e+00> : vector<4x32xf32>
    %28 = tpu.matmul %1, %27, %cst_26 {dimension_numbers = #tpu.dot_dimension_numbers<[1], [0], [0], [1], [0, 0, 1, 1], [], []>} : vector<4x32xf32>, vector<32x32xf32>, vector<4x32xf32> -> vector<4x32xf32>
    %29 = arith.mulf %28, %3 : vector<4x32xf32>
    %c0_27 = arith.constant 0 : index
    %c0_28 = arith.constant 0 : index
    %30 = vector.load %arg5[%c0_27, %c0_28] : memref<1x32xf32, #tpu.memory_space<vmem>>, vector<1x32xf32>
    %31 = vector.broadcast %30 : vector<1x32xf32> to vector<4x32xf32>
    %32 = arith.addf %29, %31 : vector<4x32xf32>
    %33 = arith.addf %19, %32 : vector<4x32xf32>
    %34 = math.tanh %26 : vector<4x32xf32>
    %35 = arith.negf %33 : vector<4x32xf32>
    %36 = math.exp %35 : vector<4x32xf32>
    %cst_29 = arith.constant 1.000000e+00 : f32
    %37 = vector.broadcast %cst_29 : f32 to vector<4x32xf32>
    %38 = arith.addf %37, %36 : vector<4x32xf32>
    %39 = arith.divf %37, %38 : vector<4x32xf32>
    %40 = arith.mulf %34, %39 : vector<4x32xf32>
    %cst_30 = arith.constant 1.000000e+00 : f32
    %41 = vector.broadcast %cst_30 : f32 to vector<4x32xf32>
    %42 = arith.subf %41, %39 : vector<4x32xf32>
    %43 = arith.mulf %0, %42 : vector<4x32xf32>
    %44 = arith.addf %40, %43 : vector<4x32xf32>
    %c0_31 = arith.constant 0 : index
    %c0_32 = arith.constant 0 : index
    %c0_33 = arith.constant 0 : index
    %45 = vector.load %arg11[%c0_31, %c0_32, %c0_33] : memref<3x4x32xf32, #tpu.memory_space<vmem>>, vector<1x4x32xf32>
    %46 = vector.shape_cast %45 : vector<1x4x32xf32> to vector<4x32xf32>
    %47 = vector.shape_cast %44 : vector<4x32xf32> to vector<1x4x32xf32>
    tpu.vector_store %arg11[%c0_31, %c0_32, %c0_33], %47 {strides = array<i32>} : memref<3x4x32xf32, #tpu.memory_space<vmem>>, vector<1x4x32xf32>,
    %c1 = arith.constant 1 : index
    %c0_34 = arith.constant 0 : index
    %c0_35 = arith.constant 0 : index
    %48 = vector.load %arg6[%c1, %c0_34, %c0_35] : memref<3x4x32xf32, #tpu.memory_space<vmem>>, vector<1x4x32xf32>
    %49 = vector.shape_cast %48 : vector<1x4x32xf32> to vector<4x32xf32>
    %c1_36 = arith.constant 1 : index
    %c0_37 = arith.constant 0 : index
    %c0_38 = arith.constant 0 : index
    %50 = vector.load %arg7[%c1_36, %c0_37, %c0_38] : memref<3x32x32xf32, #tpu.memory_space<vmem>>, vector<1x32x32xf32>
    %51 = vector.shape_cast %50 : vector<1x32x32xf32> to vector<32x32xf32>
    %cst_39 = arith.constant dense<0.000000e+00> : vector<4x32xf32>
    %52 = tpu.matmul %44, %51, %cst_39 {dimension_numbers = #tpu.dot_dimension_numbers<[1], [0], [0], [1], [0, 0, 1, 1], [], []>} : vector<4x32xf32>, vector<32x32xf32>, vector<4x32xf32> -> vector<4x32xf32>
    %53 = arith.mulf %52, %49 : vector<4x32xf32>
    %c1_40 = arith.constant 1 : index
    %c0_41 = arith.constant 0 : index
    %c0_42 = arith.constant 0 : index
    %54 = vector.load %arg9[%c1_40, %c0_41, %c0_42] : memref<3x1x32xf32, #tpu.memory_space<vmem>>, vector<1x1x32xf32>
    %55 = vector.shape_cast %54 : vector<1x1x32xf32> to vector<1x32xf32>
    %56 = vector.broadcast %55 : vector<1x32xf32> to vector<4x32xf32>
    %57 = arith.addf %53, %56 : vector<4x32xf32>
    %c1_43 = arith.constant 1 : index
    %c0_44 = arith.constant 0 : index
    %c0_45 = arith.constant 0 : index
    %58 = vector.load %arg8[%c1_43, %c0_44, %c0_45] : memref<3x32x32xf32, #tpu.memory_space<vmem>>, vector<1x32x32xf32>
    %59 = vector.shape_cast %58 : vector<1x32x32xf32> to vector<32x32xf32>
    %cst_46 = arith.constant dense<0.000000e+00> : vector<4x32xf32>
    %60 = tpu.matmul %44, %59, %cst_46 {dimension_numbers = #tpu.dot_dimension_numbers<[1], [0], [0], [1], [0, 0, 1, 1], [], []>} : vector<4x32xf32>, vector<32x32xf32>, vector<4x32xf32> -> vector<4x32xf32>
    %61 = arith.mulf %60, %49 : vector<4x32xf32>
    %c1_47 = arith.constant 1 : index
    %c0_48 = arith.constant 0 : index
    %c0_49 = arith.constant 0 : index
    %62 = vector.load %arg10[%c1_47, %c0_48, %c0_49] : memref<3x1x32xf32, #tpu.memory_space<vmem>>, vector<1x1x32xf32>
    %63 = vector.shape_cast %62 : vector<1x1x32xf32> to vector<1x32xf32>
    %64 = vector.broadcast %63 : vector<1x32xf32> to vector<4x32xf32>
    %65 = arith.addf %61, %64 : vector<4x32xf32>
    %66 = math.tanh %57 : vector<4x32xf32>
    %67 = arith.negf %65 : vector<4x32xf32>
    %68 = math.exp %67 : vector<4x32xf32>
    %cst_50 = arith.constant 1.000000e+00 : f32
    %69 = vector.broadcast %cst_50 : f32 to vector<4x32xf32>
    %70 = arith.addf %69, %68 : vector<4x32xf32>
    %71 = arith.divf %69, %70 : vector<4x32xf32>
    %72 = arith.mulf %66, %71 : vector<4x32xf32>
    %cst_51 = arith.constant 1.000000e+00 : f32
    %73 = vector.broadcast %cst_51 : f32 to vector<4x32xf32>
    %74 = arith.subf %73, %71 : vector<4x32xf32>
    %75 = arith.mulf %44, %74 : vector<4x32xf32>
    %76 = arith.addf %72, %75 : vector<4x32xf32>
    %c1_52 = arith.constant 1 : index
    %c0_53 = arith.constant 0 : index
    %c0_54 = arith.constant 0 : index
    %77 = vector.load %arg11[%c1_52, %c0_53, %c0_54] : memref<3x4x32xf32, #tpu.memory_space<vmem>>, vector<1x4x32xf32>
    %78 = vector.shape_cast %77 : vector<1x4x32xf32> to vector<4x32xf32>
    %79 = vector.shape_cast %76 : vector<4x32xf32> to vector<1x4x32xf32>
    tpu.vector_store %arg11[%c1_52, %c0_53, %c0_54], %79 {strides = array<i32>} : memref<3x4x32xf32, #tpu.memory_space<vmem>>, vector<1x4x32xf32>,
    %c2 = arith.constant 2 : index
    %c0_55 = arith.constant 0 : index
    %c0_56 = arith.constant 0 : index
    %80 = vector.load %arg6[%c2, %c0_55, %c0_56] : memref<3x4x32xf32, #tpu.memory_space<vmem>>, vector<1x4x32xf32>
    %81 = vector.shape_cast %80 : vector<1x4x32xf32> to vector<4x32xf32>
    %c2_57 = arith.constant 2 : index
    %c0_58 = arith.constant 0 : index
    %c0_59 = arith.constant 0 : index
    %82 = vector.load %arg7[%c2_57, %c0_58, %c0_59] : memref<3x32x32xf32, #tpu.memory_space<vmem>>, vector<1x32x32xf32>
    %83 = vector.shape_cast %82 : vector<1x32x32xf32> to vector<32x32xf32>
    %cst_60 = arith.constant dense<0.000000e+00> : vector<4x32xf32>
    %84 = tpu.matmul %76, %83, %cst_60 {dimension_numbers = #tpu.dot_dimension_numbers<[1], [0], [0], [1], [0, 0, 1, 1], [], []>} : vector<4x32xf32>, vector<32x32xf32>, vector<4x32xf32> -> vector<4x32xf32>
    %85 = arith.mulf %84, %81 : vector<4x32xf32>
    %c2_61 = arith.constant 2 : index
    %c0_62 = arith.constant 0 : index
    %c0_63 = arith.constant 0 : index
    %86 = vector.load %arg9[%c2_61, %c0_62, %c0_63] : memref<3x1x32xf32, #tpu.memory_space<vmem>>, vector<1x1x32xf32>
    %87 = vector.shape_cast %86 : vector<1x1x32xf32> to vector<1x32xf32>
    %88 = vector.broadcast %87 : vector<1x32xf32> to vector<4x32xf32>
    %89 = arith.addf %85, %88 : vector<4x32xf32>
    %c2_64 = arith.constant 2 : index
    %c0_65 = arith.constant 0 : index
    %c0_66 = arith.constant 0 : index
    %90 = vector.load %arg8[%c2_64, %c0_65, %c0_66] : memref<3x32x32xf32, #tpu.memory_space<vmem>>, vector<1x32x32xf32>
    %91 = vector.shape_cast %90 : vector<1x32x32xf32> to vector<32x32xf32>
    %cst_67 = arith.constant dense<0.000000e+00> : vector<4x32xf32>
    %92 = tpu.matmul %76, %91, %cst_67 {dimension_numbers = #tpu.dot_dimension_numbers<[1], [0], [0], [1], [0, 0, 1, 1], [], []>} : vector<4x32xf32>, vector<32x32xf32>, vector<4x32xf32> -> vector<4x32xf32>
    %93 = arith.mulf %92, %81 : vector<4x32xf32>
    %c2_68 = arith.constant 2 : index
    %c0_69 = arith.constant 0 : index
    %c0_70 = arith.constant 0 : index
    %94 = vector.load %arg10[%c2_68, %c0_69, %c0_70] : memref<3x1x32xf32, #tpu.memory_space<vmem>>, vector<1x1x32xf32>
    %95 = vector.shape_cast %94 : vector<1x1x32xf32> to vector<1x32xf32>
    %96 = vector.broadcast %95 : vector<1x32xf32> to vector<4x32xf32>
    %97 = arith.addf %93, %96 : vector<4x32xf32>
    %98 = math.tanh %89 : vector<4x32xf32>
    %99 = arith.negf %97 : vector<4x32xf32>
    %100 = math.exp %99 : vector<4x32xf32>
    %cst_71 = arith.constant 1.000000e+00 : f32
    %101 = vector.broadcast %cst_71 : f32 to vector<4x32xf32>
    %102 = arith.addf %101, %100 : vector<4x32xf32>
    %103 = arith.divf %101, %102 : vector<4x32xf32>
    %104 = arith.mulf %98, %103 : vector<4x32xf32>
    %cst_72 = arith.constant 1.000000e+00 : f32
    %105 = vector.broadcast %cst_72 : f32 to vector<4x32xf32>
    %106 = arith.subf %105, %103 : vector<4x32xf32>
    %107 = arith.mulf %76, %106 : vector<4x32xf32>
    %108 = arith.addf %104, %107 : vector<4x32xf32>
    %c2_73 = arith.constant 2 : index
    %c0_74 = arith.constant 0 : index
    %c0_75 = arith.constant 0 : index
    %109 = vector.load %arg11[%c2_73, %c0_74, %c0_75] : memref<3x4x32xf32, #tpu.memory_space<vmem>>, vector<1x4x32xf32>
    %110 = vector.shape_cast %109 : vector<1x4x32xf32> to vector<4x32xf32>
    %111 = vector.shape_cast %108 : vector<4x32xf32> to vector<1x4x32xf32>
    tpu.vector_store %arg11[%c2_73, %c0_74, %c0_75], %111 {strides = array<i32>} : memref<3x4x32xf32, #tpu.memory_space<vmem>>, vector<1x4x32xf32>,
    return
  }
}

</mosaic_0001>

<bundles_post_ra>
// kernel: tpu_custom_call.1
= control target key start
LH: loop header
LB: loop body
LE: loop exit
PB: predicated region body
PF: predicated region fallthrough
CT: control target
= control target key end

     0   :  { %16 = vsyncpa [#allocation3], 0  ;;  %s1005_s0 = inlined_call_operand.hbm [shape: f32[4,32], index: 0, kind: input, shape index: {}]   ;;  %s1006_s1 = inlined_call_operand.hbm [shape: f32[4,32], index: 1, kind: input, shape index: {}]   ;;  %s1007_s2 = inlined_call_operand.hbm [shape: f32[32,32], index: 2, kind: input, shape index: {}]   ;;  %s1008_s3 = inlined_call_operand.hbm [shape: f32[32,32], index: 3, kind: input, shape index: {}]   ;;  %s1009_s4 = inlined_call_operand.hbm [shape: f32[1,32], index: 4, kind: input, shape index: {}]   ;;  %s1010_s5 = inlined_call_operand.hbm [shape: f32[1,32], index: 5, kind: input, shape index: {}]   ;;  %s1011_s6 = inlined_call_operand.hbm [shape: f32[3,4,32], index: 6, kind: input, shape index: {}]   ;;  %s1012_s7 = inlined_call_operand.hbm [shape: f32[3,32,32], index: 7, kind: input, shape index: {}]   ;;  %s1013_s8 = inlined_call_operand.hbm [shape: f32[3,32,32], index: 8, kind: input, shape index: {}]   ;;  %s1014_s9 = inlined_call_operand.vmem [shape: f32[3,1,32], index: 9, kind: input, shape index: {}]   ;;  %s1015_s10 = inlined_call_operand.vmem [shape: f32[3,1,32], index: 10, kind: input, shape index: {}]   ;;  %s1016_s11 = inlined_call_operand.hbm [shape: f32[3,4,32], index: 11, kind: output, shape index: {}]  }
   0x1   :  { %17 = vsyncpa [#allocation6], 0 }
   0x2   :  { %18 = vsyncpa [#allocation9], 0 }
   0x3   :  { %19 = vsyncpa [#allocation12], 0 }
   0x4   :  { %20 = vsyncpa [#allocation15], 0  ;;  %s38_s19 = sshll.u32 %s1006_s1, 4  ;;  %s39_s19 = int_to_ptr.hbm [resolvable:$true] %s38_s19 }
   0x5   :  { %21 = vsyncpa [#allocation4], 0  ;;  %s849_s20 = smov [#allocation5]   ;;  %s61_s24 = sshll.u32 %s1008_s3, 4  ;;  %s62_s24 = int_to_ptr.hbm [resolvable:$true] %s61_s24 }
   0x6   :  { %s40_s21 = sshll.u32 %s849_s20, 4  ;;  %s850_s25 = smov [#allocation8]   ;;  %s41_s21 = int_to_ptr.vmem [resolvable:$true] %s40_s21 }
   0x7   :  { %43 = dma.hbm_to_vmem [thread:$0]  %s39_s19, 64, %s41_s21, [#allocation6]  }
   0x8   :  { %s63_s26 = sshll.u32 %s850_s25, 4  ;;  %s86_s29 = sshll.u32 %s1010_s5, 4  ;;  %s64_s26 = int_to_ptr.vmem [resolvable:$true] %s63_s26  ;;  %s87_s29 = int_to_ptr.hbm [resolvable:$true] %s86_s29 }
   0x9   :  { %s851_s1 = smov 128   ;;  %s852_s30 = smov 8  }
   0xa   :  { %69 = dma.hbm_to_vmem [thread:$0]  %s62_s24, 512, %s64_s26, [#allocation9], %s851_s1, %s851_s1, %s852_s30  }
   0xb   :  { %s109_s14 = sshll.u32 %s1012_s7, 4  ;;  %s853_s3 = smov [#allocation11]   ;;  %s110_s14 = int_to_ptr.hbm [resolvable:$true] %s109_s14 }
   0xc   :  { %s88_s15 = sshll.u32 %s853_s3, 4  ;;  %s854_s16 = smov [#allocation14]   ;;  %s89_s15 = int_to_ptr.vmem [resolvable:$true] %s88_s15 }
   0xd   :  { %91 = dma.hbm_to_vmem [thread:$0]  %s87_s29, 16, %s89_s15, [#allocation12]  }
   0xe   :  { %s111_s17 = sshll.u32 %s854_s16, 4  ;;  %s27_s19 = sshll.u32 %s1005_s0, 4  ;;  %s112_s17 = int_to_ptr.vmem [resolvable:$true] %s111_s17  ;;  %s28_s19 = int_to_ptr.hbm [resolvable:$true] %s27_s19 }
   0xf   :  { %117 = dma.hbm_to_vmem [thread:$0]  %s110_s14, 1536, %s112_s17, [#allocation15], %s851_s1, %s851_s1, %s852_s30  }
  0x10   :  { %s48_s7 = sshll.u32 %s1007_s2, 4  ;;  %s855_s22 = smov [#allocation2]   ;;  %s49_s7 = int_to_ptr.hbm [resolvable:$true] %s48_s7 }
  0x11   :  { %s29_s23 = sshll.u32 %s855_s22, 4  ;;  %s856_s24 = smov [#allocation7]   ;;  %s30_s23 = int_to_ptr.vmem [resolvable:$true] %s29_s23 }
  0x12   :  { %32 = dma.hbm_to_vmem [thread:$0]  %s28_s19, 64, %s30_s23, [#allocation3]  }
  0x13   :  { %s50_s25 = sshll.u32 %s856_s24, 4  ;;  %s75_s0 = sshll.u32 %s1009_s4, 4  ;;  %s51_s25 = int_to_ptr.vmem [resolvable:$true] %s50_s25  ;;  %s76_s0 = int_to_ptr.hbm [resolvable:$true] %s75_s0 }
  0x14   :  { %56 = dma.hbm_to_vmem [thread:$0]  %s49_s7, 512, %s51_s25, [#allocation6], %s851_s1, %s851_s1, %s852_s30  }
  0x15   :  { %s96_s2 = sshll.u32 %s1011_s6, 4  ;;  %s857_s12 = smov [#allocation10]   ;;  %s97_s2 = int_to_ptr.hbm [resolvable:$true] %s96_s2 }
  0x16   :  { %s77_s13 = sshll.u32 %s857_s12, 4  ;;  %s858_s14 = smov [#allocation13]   ;;  %s78_s13 = int_to_ptr.vmem [resolvable:$true] %s77_s13 }
  0x17   :  { %80 = dma.hbm_to_vmem [thread:$0]  %s76_s0, 16, %s78_s13, [#allocation9]  }
  0x18   :  { %s98_s3 = sshll.u32 %s858_s14, 4  ;;  %s859_s15 = smov 64   ;;  %s99_s3 = int_to_ptr.vmem [resolvable:$true] %s98_s3 }
  0x19   :  { %s860_s4 = smov 4   ;;  %s122_s5 = sshll.u32 %s1013_s8, 4  ;;  %s123_s5 = int_to_ptr.hbm [resolvable:$true] %s122_s5 }
  0x1a   :  { %104 = dma.hbm_to_vmem [thread:$0]  %s97_s2, 192, %s99_s3, [#allocation12], %s859_s15, %s859_s15, %s860_s4  }
  0x1b   :  { %s861_s6 = smov [#allocation16]  }
  0x1c   :  { %s124_s18 = sshll.u32 %s861_s6, 4  ;;  %s125_s18 = int_to_ptr.vmem [resolvable:$true] %s124_s18 }
  0x1d   :  { %130 = dma.hbm_to_vmem [thread:$0]  %s123_s5, 1536, %s125_s18, [#allocation15], %s851_s1, %s851_s1, %s852_s30  }
  0x1e   :  { %837 = dma.done.wait [#allocation3], 64  }
  0x1f   :  { %838 = vsyncadd [#allocation3], 4294967232 }
  0x20   :  { %839 = dma.done.wait [#allocation6], 576  }
  0x21   :  { %840 = vsyncadd [#allocation6], 4294966720 }
  0x22   :  { %841 = dma.done.wait [#allocation9], 528  }
  0x23   :  { %842 = vsyncadd [#allocation9], 4294966768 }
  0x24   :  { %843 = dma.done.wait [#allocation12], 208  }
  0x25   :  { %844 = vsyncadd [#allocation12], 4294967088 }
  0x26   :  { %845 = dma.done.wait [#allocation15], 3072  }
  0x27   :  { %846 = vsyncadd [#allocation15], 4294964224  ;;  %v275_v0 = vld [vmem:[#allocation8 + $0x18] sm:$0xff]  ;;  %v274_v1 = vld [vmem:[#allocation8 + $0x10] sm:$0xff]  ;;  %vm178_vm0 = vcmask 261120   ;;  %vm327_vm5 = vcmask 257024  }
  0x28   :  { %288 = vmatpush.msra.mxu3 %v275_v0  ;;  %v211_v2 = vld [vmem:[#allocation16 + $0x18] sm:$0xff]  ;;  %v272_v4 = vld [vmem:[#allocation8] sm:$0xff]  ;;  %v209_v6 = vld [vmem:[#allocation16 + $0x8] sm:$0xff]  ;;  %s525_s28 = sshll.u32 %s1016_s11, 4  ;;  %s526_s28 = int_to_ptr.hbm [resolvable:$true] %s525_s28 }
  0x29   :  { %v273_v3 = vld [vmem:[#allocation8 + $0x8] sm:$0xff]  ;;  %224 = vmatpush.msra.mxu1 %v211_v2  ;;  %v210_v5 = vld [vmem:[#allocation16 + $0x10] sm:$0xff]  ;;  %v241_v7 = vld [vmem:[#allocation7 + $0x18] sm:$0xff] }
  0x2a   :  { %289 = vmatpush.msra.mxu3 %v274_v1  ;;  %v240_v8 = vld [vmem:[#allocation7 + $0x10] sm:$0xff]  ;;  %v172_v9 = vld [vmem:[#allocation2] sm:$0xf]  ;;  %257 = vmatpush.msra.mxu2 %v241_v7  ;;  %v177_v11 = vld [vmem:[#allocation14 + $0x18] sm:$0xff] }
  0x2b   :  { %225 = vmatpush.msra.mxu1 %v210_v5  ;;  %v208_v10 = vld [vmem:[#allocation16] sm:$0xff]  ;;  %v965_v12 = vld [vmem:[#allocation5] sm:$0xf]  ;;  %v239_v13 = vld [vmem:[#allocation7 + $0x8] sm:$0xff]  ;;  %194 = vmatpush.msra.mxu0 %v177_v11 }
  0x2c   :  { %290 = vmatpush.msra.mxu3 %v273_v3  ;;  %v176_v14 = vld [vmem:[#allocation14 + $0x10] sm:$0xff]  ;;  %258 = vmatpush.msra.mxu2 %v240_v8  ;;  %v175_v16 = vld [vmem:[#allocation14 + $0x8] sm:$0xff]  ;;  %v174_v17 = vld [vmem:[#allocation14] sm:$0xff] }
  0x2d   :  { %226 = vmatpush.msra.mxu1 %v209_v6  ;;  %v238_v15 = vld [vmem:[#allocation7] sm:$0xff]  ;;  %195 = vmatpush.msra.mxu0 %v176_v14  ;;  %v370_v20 = vld [vmem:[#allocation16 + $0x38] sm:$0xff]  ;;  %v571_v25 = vld [vmem:[%s1015_s10] ss:$0 sm:$0xff] }
  0x2e   :  { %291 = vmatpush.msra.mxu3 %v272_v4  ;;  %259 = vmatpush.msra.mxu2 %v239_v13  ;;  %v173_v18 = vld [vmem:[#allocation13] sm:$0xf]  ;;  %v335_v21 = vld [vmem:[#allocation14 + $0x38] sm:$0xff]  ;;  %v368_v26 = vld [vmem:[#allocation16 + $0x28] sm:$0xff] }
  0x2f   :  { %545 = vmatmul.msk.f32.vlgmr.msra.gmra.mxu3 %vm178_vm0, %v172_v9  ;;  %227 = vmatpush.msra.mxu1 %v208_v10  ;;  %v369_v22 = vld [vmem:[#allocation16 + $0x30] sm:$0xff]  ;;  %v333_v27 = vld [vmem:[#allocation14 + $0x28] sm:$0xff]  ;;  %v367_v29 = vld [vmem:[#allocation16 + $0x20] sm:$0xff] }
  0x30   :  { %543 = vmatmul.msk.f32.vlgmr.msra.gmra.mxu1 %vm178_vm0, %v965_v12  ;;  %196 = vmatpush.msra.mxu0 %v175_v16  ;;  %v334_v23 = vld [vmem:[#allocation14 + $0x30] sm:$0xff]  ;;  %v332_v30 = vld [vmem:[#allocation14 + $0x20] sm:$0xff]  ;;  %v573_v42 = vld [vmem:[%s1014_s9] ss:$0 sm:$0xff] }
  0x31   :  { %260 = vmatpush.msra.mxu2 %v238_v15  ;;  %383 = vmatpush.msrb.mxu1 %v370_v20  ;;  %v572_v28 = vld [vmem:[#allocation11] ss:$0 sm:$0xff]  ;;  %v574_v44 = vld [vmem:[#allocation10] ss:$0 sm:$0xff]  ;;  %v465_v63 = vld [vmem:[#allocation16 + $0x58] sm:$0xff] }
  0x32   :  { %544 = vmatmul.msk.f32.vlgmr.msra.gmra.mxu2 %vm178_vm0, %v172_v9  ;;  %197 = vmatpush.msra.mxu0 %v174_v17  ;;  %v430_v0 = vld [vmem:[#allocation14 + $0x58] sm:$0xff]  ;;  %v464_v1 = vld [vmem:[#allocation16 + $0x50] sm:$0xff]  ;;  %v463_v3 = vld [vmem:[#allocation16 + $0x48] sm:$0xff] }
  0x33   :  { %542 = vmatmul.msk.f32.vlgmr.msra.gmra.mxu0 %vm178_vm0, %v965_v12  ;;  %384 = vmatpush.msrb.mxu1 %v369_v22  ;;  %v429_v2 = vld [vmem:[#allocation14 + $0x50] sm:$0xff]  ;;  %v428_v4 = vld [vmem:[#allocation14 + $0x48] sm:$0xff]  ;;  %v462_v5 = vld [vmem:[#allocation16 + $0x40] sm:$0xff] }
  0x34   :  { %351 = vmatpush.msrb.mxu0 %v335_v21  ;;  %478 = vmatpush.msrb.mxu3 %v465_v63  ;;  %v427_v6 = vld [vmem:[#allocation14 + $0x40] sm:$0xff]  ;;  %v330_v7 = vld [vmem:[#allocation13 + $0x4] sm:$0xf]  ;;  %v576_v8 = vld [vmem:[%s1015_s10 + $0x1] ss:$0 sm:$0xff] }
  0x35   :  { %385 = vmatpush.msrb.mxu1 %v368_v26  ;;  %446 = vmatpush.msrb.mxu2 %v430_v0  ;;  %v575_v17 = vld [vmem:[%s1014_s9 + $0x1] ss:$0 sm:$0xff] }
  0x36   :  { %352 = vmatpush.msrb.mxu0 %v334_v23  ;;  %479 = vmatpush.msrb.mxu3 %v464_v1 }
  0x37   :  { %386 = vmatpush.msrb.mxu1 %v367_v29  ;;  %447 = vmatpush.msrb.mxu2 %v429_v2 }
  0x38   :  { %353 = vmatpush.msrb.mxu0 %v333_v27  ;;  %480 = vmatpush.msrb.mxu3 %v463_v3 }
  0x39   :  { %448 = vmatpush.msrb.mxu2 %v428_v4 }
  0x3a   :  { %354 = vmatpush.msrb.mxu0 %v332_v30  ;;  %481 = vmatpush.msrb.mxu3 %v462_v5 }
  0x3b   :  { %449 = vmatpush.msrb.mxu2 %v427_v6 }
  0xad   :  { %v229_v19 = vpop.f32.mrf.mxu1 }
  0xae   :  { %v232_v24 = vmul.f32 %v229_v19, %v173_v18 }
  0xb0   :  { %v237_v32 = vadd.f32 %v571_v25, %v232_v24  ;;  %v199_v37 = vpop.f32.mrf.mxu0 }
  0xb1   :  { %v202_v41 = vmul.f32 %v199_v37, %v173_v18 }
  0xb2   :  { %v293_v31 = vpop.f32.mrf.mxu3 }
  0xb3   :  { %v296_v33 = vmul.f32 %v293_v31, %v173_v18  ;;  %v207_v45 = vadd.f32 %v573_v42, %v202_v41 }
  0xb5   :  { %v301_v34 = vadd.f32 %v572_v28, %v296_v33  ;;  %v262_v38 = vpop.f32.mrf.mxu2 }
  0xb6   :  { %v265_v43 = vmul.f32 %v262_v38, %v173_v18 }
  0xb7   :  { %v302_v35 = vadd.f32 %v301_v34, %v237_v32  ;;  %v425_v34 = vld [vmem:[#allocation13 + $0x8] sm:$0xf] }
  0xb8   :  { %v270_v46 = vadd.f32 %v574_v44, %v265_v43  ;;  %v577_v44 = vld [vmem:[%s1014_s9 + $0x2] ss:$0 sm:$0xff] }
  0xb9   :  { %v546_v36 = vmul.f32 -1.442695, %v302_v35  ;;  %v578_v35 = vld [vmem:[%s1015_s10 + $0x2] ss:$0 sm:$0xff]  ;;  %s862_s10 = smov [#allocation17]  }
  0xba   :  { %v271_v48 = vadd.f32 %v270_v46, %v207_v45  ;;  %s523_s9 = sshll.u32 %s862_s10, 4  ;;  %s524_s9 = int_to_ptr.vmem [resolvable:$true] %s523_s9 }
  0xbb   :  { %579 = vpow2.f32 %v546_v36 }
  0xc1   :  { %v580_v39 = vpop.eup %579 }
  0xc2   :  { %v307_v40 = vadd.f32 1.0, %v580_v39 }
  0xc4   :  { %581 = vrcp.f32 %v307_v40  ;;  %v319_v51 = vand.u32 2147483648, %v307_v40  ;;  %v317_v53 = vand.u32 2147483647, %v307_v40  ;;  %vm313_vm2 = vweird.f32 %v307_v40 }
  0xc5   :  { %583 = vtanh.f32 %v271_v48 }
  0xc6   :  { %v320_v55 = vor.u32 1.1754944e-38, %v319_v51  ;;  %vm318_vm4 = vcmp.eq.f32.partialorder %v317_v53, 8.507059e+37 }
  0xca   :  { %v582_v47 = vpop.eup %581 }
  0xcb   :  { %v309_v49 = vmul.f32 %v582_v47, %v307_v40  ;;  %vm314_vm1 = vweird.f32 %v582_v47  ;;  %v584_v57 = vpop.eup %583 }
  0xcc   :  { %vm315_vm3 = vmor %vm313_vm2, %vm314_vm1 }
  0xcd   :  { %v310_v50 = vsub.f32 1.0, %v309_v49 }
  0xcf   :  { %v311_v52 = vmul.f32 %v582_v47, %v310_v50 }
  0xd1   :  { %v312_v54 = vadd.f32 %v582_v47, %v311_v52 }
  0xd3   :  { %v316_v56 = vsel %vm315_vm3, %v582_v47, %v312_v54 }
  0xd4   :  { %v321_v58 = vsel %vm318_vm4, %v320_v55, %v316_v56 }
  0xd5   :  { %v324_v59 = vsub.f32 1.0, %v321_v58  ;;  %v323_v60 = vmul.f32 %v584_v57, %v321_v58 }
  0xd7   :  { %v325_v61 = vmul.f32 %v324_v59, %v965_v12 }
  0xd9   :  { %v326_v62 = vadd.f32 %v325_v61, %v323_v60 }
  0xdb   :  { %547 = vmatmul.msk.f32.vlgmr.msrb.gmra.mxu0 %vm178_vm0, %v326_v62  ;;  %549 = vmatmul.msk.f32.vlgmr.msrb.gmra.mxu1 %vm178_vm0, %v326_v62  ;;  %328 = vst.msk [vmem:[#allocation17] sm:$0xf] %vm327_vm5, %v326_v62 }
 0x158   :  { %v388_v9 = vpop.f32.mrf.mxu1  ;;  %v356_v15 = vpop.f32.mrf.mxu0 }
 0x159   :  { %v391_v10 = vmul.f32 %v388_v9, %v330_v7  ;;  %v359_v16 = vmul.f32 %v356_v15, %v330_v7 }
 0x15b   :  { %v397_v11 = vadd.f32 %v576_v8, %v391_v10  ;;  %v365_v20 = vadd.f32 %v575_v17, %v359_v16 }
 0x15d   :  { %v551_v12 = vmul.f32 -1.442695, %v397_v11 }
 0x15f   :  { %585 = vpow2.f32 %v551_v12 }
 0x165   :  { %v586_v13 = vpop.eup %585 }
 0x166   :  { %v402_v14 = vadd.f32 1.0, %v586_v13 }
 0x168   :  { %587 = vrcp.f32 %v402_v14  ;;  %v414_v22 = vand.u32 2147483648, %v402_v14  ;;  %v412_v24 = vand.u32 2147483647, %v402_v14  ;;  %vm408_vm7 = vweird.f32 %v402_v14 }
 0x169   :  { %589 = vtanh.f32 %v365_v20 }
 0x16a   :  { %v415_v26 = vor.u32 1.1754944e-38, %v414_v22  ;;  %vm413_vm9 = vcmp.eq.f32.partialorder %v412_v24, 8.507059e+37 }
 0x16e   :  { %v588_v18 = vpop.eup %587 }
 0x16f   :  { %v404_v19 = vmul.f32 %v588_v18, %v402_v14  ;;  %vm409_vm6 = vweird.f32 %v588_v18  ;;  %v590_v30 = vpop.eup %589 }
 0x170   :  { %vm410_vm8 = vmor %vm408_vm7, %vm409_vm6 }
 0x171   :  { %v405_v21 = vsub.f32 1.0, %v404_v19 }
 0x173   :  { %v406_v23 = vmul.f32 %v588_v18, %v405_v21 }
 0x175   :  { %v407_v25 = vadd.f32 %v588_v18, %v406_v23 }
 0x177   :  { %v411_v27 = vsel %vm410_vm8, %v588_v18, %v407_v25 }
 0x178   :  { %v416_v28 = vsel %vm413_vm9, %v415_v26, %v411_v27 }
 0x179   :  { %v419_v29 = vsub.f32 1.0, %v416_v28  ;;  %v418_v31 = vmul.f32 %v590_v30, %v416_v28 }
 0x17b   :  { %v420_v32 = vmul.f32 %v419_v29, %v326_v62 }
 0x17d   :  { %v421_v33 = vadd.f32 %v420_v32, %v418_v31 }
 0x17f   :  { %552 = vmatmul.msk.f32.vlgmr.msrb.gmra.mxu2 %vm178_vm0, %v421_v33  ;;  %554 = vmatmul.msk.f32.vlgmr.msrb.gmra.mxu3 %vm178_vm0, %v421_v33  ;;  %423 = vst.msk [vmem:[#allocation17 + $0x4] sm:$0xf] %vm327_vm5, %v421_v33 }
 0x202   :  { %v483_v36 = vpop.f32.mrf.mxu3  ;;  %v451_v42 = vpop.f32.mrf.mxu2 }
 0x203   :  { %v486_v37 = vmul.f32 %v483_v36, %v425_v34  ;;  %v454_v43 = vmul.f32 %v451_v42, %v425_v34 }
 0x205   :  { %v492_v38 = vadd.f32 %v578_v35, %v486_v37  ;;  %v460_v47 = vadd.f32 %v577_v44, %v454_v43 }
 0x207   :  { %v556_v39 = vmul.f32 -1.442695, %v492_v38 }
 0x209   :  { %591 = vpow2.f32 %v556_v39 }
 0x20f   :  { %v592_v40 = vpop.eup %591 }
 0x210   :  { %v497_v41 = vadd.f32 1.0, %v592_v40 }
 0x212   :  { %593 = vrcp.f32 %v497_v41  ;;  %v509_v49 = vand.u32 2147483648, %v497_v41  ;;  %v507_v51 = vand.u32 2147483647, %v497_v41  ;;  %vm503_vm11 = vweird.f32 %v497_v41 }
 0x213   :  { %595 = vtanh.f32 %v460_v47 }
 0x214   :  { %v510_v53 = vor.u32 1.1754944e-38, %v509_v49  ;;  %vm508_vm13 = vcmp.eq.f32.partialorder %v507_v51, 8.507059e+37 }
 0x218   :  { %v594_v45 = vpop.eup %593 }
 0x219   :  { %v499_v46 = vmul.f32 %v594_v45, %v497_v41  ;;  %vm504_vm10 = vweird.f32 %v594_v45  ;;  %v596_v57 = vpop.eup %595 }
 0x21a   :  { %vm505_vm12 = vmor %vm503_vm11, %vm504_vm10 }
 0x21b   :  { %v500_v48 = vsub.f32 1.0, %v499_v46 }
 0x21d   :  { %v501_v50 = vmul.f32 %v594_v45, %v500_v48 }
 0x21f   :  { %v502_v52 = vadd.f32 %v594_v45, %v501_v50 }
 0x221   :  { %v506_v54 = vsel %vm505_vm12, %v594_v45, %v502_v52 }
 0x222   :  { %v511_v55 = vsel %vm508_vm13, %v510_v53, %v506_v54 }
 0x223   :  { %v514_v56 = vsub.f32 1.0, %v511_v55  ;;  %v513_v58 = vmul.f32 %v596_v57, %v511_v55 }
 0x225   :  { %v515_v59 = vmul.f32 %v514_v56, %v421_v33 }
 0x227   :  { %v516_v60 = vadd.f32 %v515_v59, %v513_v58 }
 0x229   :  { %518 = vst.msk [vmem:[#allocation17 + $0x8] sm:$0xf] %vm327_vm5, %v516_v60 }
 0x22a   :  { %531 = dma.vmem_to_hbm [thread:$0]  %s524_s9, 192, %s526_s28, [#allocation4], %s859_s15, %s859_s15, %s860_s4  }
 0x22b   :  { %847 = dma.done.wait [#allocation4], 192  }
 0x22c   :  { %848 = vsyncadd [#allocation4], 4294967104 }
 0x22d   :  { %536 = vsyncpa [#allocation3], 1 }
 0x22e   :  { %537 = vsyncpa [#allocation6], 1 }
 0x22f   :  { %538 = vsyncpa [#allocation9], 1 }
 0x230   :  { %539 = vsyncpa [#allocation12], 1 }
 0x231   :  { %540 = vsyncpa [#allocation15], 1 }
 0x232   :  { %541 = vsyncpa [#allocation4], 1 }

</bundles_post_ra>
